<compile_context>
chip_gen: v7x
topology: tpu7x:2x2x1
jax: 0.10.0
libtpu: 0.0.40
codegen_flags: <defaults>
</compile_context>

<pallas_src>
import math

import jax
import jax.numpy as jnp
from jax.experimental import pallas as pl
from jax.experimental.pallas import tpu as pltpu  # noqa: F401  (TPU backend)


HIDDEN_SIZE = 16  # fixed by the PyTorch module


def _lstm_cell_kernel(x_ref, h_ref, c_ref, wx_ref, wh_ref, b_ref, hc_ref):
    """One LSTM step. Gates come from a single fused (B, 4H) pre-activation."""
    H = HIDDEN_SIZE
    c_prev = c_ref[...]                                   # (B, H) f32

    # Fused gate pre-activations: x @ W_x + h @ W_h + b  -> (B, 4H), f32 acc.
    z = (jnp.dot(x_ref[...], wx_ref[...], preferred_element_type=jnp.float32)
         + jnp.dot(h_ref[...], wh_ref[...], preferred_element_type=jnp.float32)
         + b_ref[...])

    f_t = jax.nn.sigmoid(z[:, 0 * H:1 * H])
    i_t = jax.nn.sigmoid(z[:, 1 * H:2 * H])
    c_tilde = jnp.tanh(z[:, 2 * H:3 * H])
    o_t = jax.nn.sigmoid(z[:, 3 * H:4 * H])

    c_t = f_t * c_prev + i_t * c_tilde
    h_t = o_t * jnp.tanh(c_t)

    # Single lane-dense store: [h_t | c_t] packed along the lane axis.
    hc_ref[...] = jnp.concatenate([h_t, c_t], axis=1)     # (B, 2H)


def prepare_params(params, input_size, compute_dtype=jnp.float32):
    """One-time fusion/transpose of the PyTorch-layout parameters.

    params: dict with W_f/W_i/W_C/W_o of shape (H, input+H) and b_* of (H,).
    Returns {"W_x": (input, 4H), "W_h": (H, 4H), "b": (1, 4H)} with weights in
    `compute_dtype` (use bf16 on v6e/v7x for the MXU fast path) and bias f32.
    """
    H = HIDDEN_SIZE
    w_all = jnp.concatenate(
        [params["W_f"], params["W_i"], params["W_C"], params["W_o"]], axis=0
    )                                                     # (4H, input+H)
    w_x = w_all[:, :input_size].T                         # (input, 4H)
    w_h = w_all[:, input_size:].T                         # (H, 4H)
    b_all = jnp.concatenate(
        [params["b_f"], params["b_i"], params["b_C"], params["b_o"]]
    ).reshape(1, 4 * H)                                   # (1, 4H)
    return {
        "W_x": w_x.astype(compute_dtype),
        "W_h": w_h.astype(compute_dtype),
        "b": b_all.astype(jnp.float32),
    }


def lstm_cell_forward(x, h_prev, c_prev, fused):
    """One LSTM_Cell.forward step. Returns (h_t, C_t), each (B, 16), f32."""
    B = x.shape[0]
    In = x.shape[1]
    H = HIDDEN_SIZE
    compute_dtype = fused["W_x"].dtype

    xq = x.astype(compute_dtype)
    hq = h_prev.astype(compute_dtype)
    c_f32 = c_prev.astype(jnp.float32)

    # Single grid point; every operand is one full-extent block.
    full = lambda shape: pl.BlockSpec(shape, lambda: (0,) * len(shape))

    hc = pl.pallas_call(
        _lstm_cell_kernel,
        out_shape=jax.ShapeDtypeStruct((B, 2 * H), jnp.float32),
        grid=(),
        in_specs=[
            full((B, In)),        # x
            full((B, H)),         # h_prev
            full((B, H)),         # c_prev
            full((In, 4 * H)),    # W_x  (fused, pre-transposed)
            full((H, 4 * H)),     # W_h
            full((1, 4 * H)),     # bias (fused)
        ],
        out_specs=full((B, 2 * H)),
    )(xq, hq, c_f32, fused["W_x"], fused["W_h"], fused["b"])

    return hc[:, :H], hc[:, H:]


def init_params(key, input_size):
    """Deterministic init matching nn.Parameter uniform_(-stdv, stdv)."""
    H = HIDDEN_SIZE
    D = input_size + H
    stdv = 1.0 / math.sqrt(H)
    keys = jax.random.split(key, 8)
    u = lambda k, shape: jax.random.uniform(k, shape, jnp.float32, -stdv, stdv)
    return {
        "W_f": u(keys[0], (H, D)), "b_f": u(keys[1], (H,)),
        "W_i": u(keys[2], (H, D)), "b_i": u(keys[3], (H,)),
        "W_C": u(keys[4], (H, D)), "b_C": u(keys[5], (H,)),
        "W_o": u(keys[6], (H, D)), "b_o": u(keys[7], (H,)),
    }


def _reference(x, h_prev, c_prev, p):
    """Pure-JAX f32 reference matching the PyTorch forward exactly."""
    comb = jnp.concatenate([x, h_prev], axis=1)
    f = jax.nn.sigmoid(comb @ p["W_f"].T + p["b_f"])
    i = jax.nn.sigmoid(comb @ p["W_i"].T + p["b_i"])
    ct = jnp.tanh(comb @ p["W_C"].T + p["b_C"])
    c = f * c_prev + i * ct
    o = jax.nn.sigmoid(comb @ p["W_o"].T + p["b_o"])
    return o * jnp.tanh(c), c


if __name__ == "__main__":
    key = jax.random.PRNGKey(0)
    k_param, k_x, k_h, k_c = jax.random.split(key, 4)

    batch = 8          # fill the 8 f32 sublanes of a vreg row
    input_size = 32

    params = init_params(k_param, input_size)
    x = jax.random.normal(k_x, (batch, input_size), jnp.float32)
    h0 = jax.random.normal(k_h, (batch, HIDDEN_SIZE), jnp.float32)
    c0 = jax.random.normal(k_c, (batch, HIDDEN_SIZE), jnp.float32)

    h_ref, c_ref = _reference(x, h0, c0, params)

    # f32 matmul path (exact): tight tolerance.
    fused_f32 = prepare_params(params, input_size, compute_dtype=jnp.float32)
    h_t, c_t = lstm_cell_forward(x, h0, c0, fused_f32)
    jax.block_until_ready((h_t, c_t))
    assert jnp.allclose(h_t, h_ref, atol=1e-5, rtol=1e-5)
    assert jnp.allclose(c_t, c_ref, atol=1e-5, rtol=1e-5)

    # bf16 matmul path (MXU fast path on v6e/v7x), f32 accumulation/update.
    fused_bf16 = prepare_params(params, input_size, compute_dtype=jnp.bfloat16)
    h_b, c_b = lstm_cell_forward(x, h0, c0, fused_bf16)
    jax.block_until_ready((h_b, c_b))
    assert jnp.allclose(h_b, h_ref, atol=2e-2, rtol=2e-2)
    assert jnp.allclose(c_b, c_ref, atol=2e-2, rtol=2e-2)

    print("KERNEL_OK")
</pallas_src>

<mosaic_0001>
module attributes {stable_mosaic.version = 11 : i64} {
  func.func @_lstm_cell_kernel(%arg0: memref<8x32xf32, #tpu.memory_space<vmem>>, %arg1: memref<8x16xf32, #tpu.memory_space<vmem>>, %arg2: memref<8x16xf32, #tpu.memory_space<vmem>>, %arg3: memref<32x64xf32, #tpu.memory_space<vmem>>, %arg4: memref<16x64xf32, #tpu.memory_space<vmem>>, %arg5: memref<1x64xf32, #tpu.memory_space<vmem>>, %arg6: memref<8x32xf32, #tpu.memory_space<vmem>>) attributes {dimension_semantics = [], scalar_prefetch = 0 : i64, scratch_operands = 0 : i64, tpu.core_type = #tpu.core_type<tc>} {
    %c0 = arith.constant 0 : index
    %c0_0 = arith.constant 0 : index
    %0 = vector.load %arg2[%c0, %c0_0] : memref<8x16xf32, #tpu.memory_space<vmem>>, vector<8x16xf32>
    %c0_1 = arith.constant 0 : index
    %c0_2 = arith.constant 0 : index
    %1 = vector.load %arg0[%c0_1, %c0_2] : memref<8x32xf32, #tpu.memory_space<vmem>>, vector<8x32xf32>
    %c0_3 = arith.constant 0 : index
    %c0_4 = arith.constant 0 : index
    %2 = vector.load %arg3[%c0_3, %c0_4] : memref<32x64xf32, #tpu.memory_space<vmem>>, vector<32x64xf32>
    %cst = arith.constant dense<0.000000e+00> : vector<8x64xf32>
    %3 = tpu.matmul %1, %2, %cst {dimension_numbers = #tpu.dot_dimension_numbers<[1], [0], [0], [1], [0, 0, 1, 1], [], []>} : vector<8x32xf32>, vector<32x64xf32>, vector<8x64xf32> -> vector<8x64xf32>
    %c0_5 = arith.constant 0 : index
    %c0_6 = arith.constant 0 : index
    %4 = vector.load %arg1[%c0_5, %c0_6] : memref<8x16xf32, #tpu.memory_space<vmem>>, vector<8x16xf32>
    %c0_7 = arith.constant 0 : index
    %c0_8 = arith.constant 0 : index
    %5 = vector.load %arg4[%c0_7, %c0_8] : memref<16x64xf32, #tpu.memory_space<vmem>>, vector<16x64xf32>
    %cst_9 = arith.constant dense<0.000000e+00> : vector<8x64xf32>
    %6 = tpu.matmul %4, %5, %cst_9 {dimension_numbers = #tpu.dot_dimension_numbers<[1], [0], [0], [1], [0, 0, 1, 1], [], []>} : vector<8x16xf32>, vector<16x64xf32>, vector<8x64xf32> -> vector<8x64xf32>
    %7 = arith.addf %3, %6 : vector<8x64xf32>
    %c0_10 = arith.constant 0 : index
    %c0_11 = arith.constant 0 : index
    %8 = vector.load %arg5[%c0_10, %c0_11] : memref<1x64xf32, #tpu.memory_space<vmem>>, vector<1x64xf32>
    %9 = vector.broadcast %8 : vector<1x64xf32> to vector<8x64xf32>
    %10 = arith.addf %7, %9 : vector<8x64xf32>
    %11 = vector.extract_strided_slice %10 {offsets = [0, 0], sizes = [8, 16], strides = [1, 1]} : vector<8x64xf32> to vector<8x16xf32>
    %12 = arith.negf %11 : vector<8x16xf32>
    %13 = math.exp %12 : vector<8x16xf32>
    %cst_12 = arith.constant 1.000000e+00 : f32
    %14 = vector.broadcast %cst_12 : f32 to vector<8x16xf32>
    %15 = arith.addf %14, %13 : vector<8x16xf32>
    %16 = arith.divf %14, %15 : vector<8x16xf32>
    %17 = vector.extract_strided_slice %10 {offsets = [0, 16], sizes = [8, 16], strides = [1, 1]} : vector<8x64xf32> to vector<8x16xf32>
    %18 = arith.negf %17 : vector<8x16xf32>
    %19 = math.exp %18 : vector<8x16xf32>
    %cst_13 = arith.constant 1.000000e+00 : f32
    %20 = vector.broadcast %cst_13 : f32 to vector<8x16xf32>
    %21 = arith.addf %20, %19 : vector<8x16xf32>
    %22 = arith.divf %20, %21 : vector<8x16xf32>
    %23 = vector.extract_strided_slice %10 {offsets = [0, 32], sizes = [8, 16], strides = [1, 1]} : vector<8x64xf32> to vector<8x16xf32>
    %24 = math.tanh %23 : vector<8x16xf32>
    %25 = vector.extract_strided_slice %10 {offsets = [0, 48], sizes = [8, 16], strides = [1, 1]} : vector<8x64xf32> to vector<8x16xf32>
    %26 = arith.negf %25 : vector<8x16xf32>
    %27 = math.exp %26 : vector<8x16xf32>
    %cst_14 = arith.constant 1.000000e+00 : f32
    %28 = vector.broadcast %cst_14 : f32 to vector<8x16xf32>
    %29 = arith.addf %28, %27 : vector<8x16xf32>
    %30 = arith.divf %28, %29 : vector<8x16xf32>
    %31 = arith.mulf %16, %0 : vector<8x16xf32>
    %32 = arith.mulf %22, %24 : vector<8x16xf32>
    %33 = arith.addf %31, %32 : vector<8x16xf32>
    %34 = math.tanh %33 : vector<8x16xf32>
    %35 = arith.mulf %30, %34 : vector<8x16xf32>
    %36 = tpu.concatenate %35, %33 in 1 : vector<8x16xf32>, vector<8x16xf32> -> vector<8x32xf32>
    %c0_15 = arith.constant 0 : index
    %c0_16 = arith.constant 0 : index
    %37 = vector.load %arg6[%c0_15, %c0_16] : memref<8x32xf32, #tpu.memory_space<vmem>>, vector<8x32xf32>
    tpu.vector_store %arg6[%c0_15, %c0_16], %36 {strides = array<i32>} : memref<8x32xf32, #tpu.memory_space<vmem>>, vector<8x32xf32>,
    return
  }
}

</mosaic_0001>

<bundles_post_ra>
// kernel: tpu_custom_call.1
= control target key start
LH: loop header
LB: loop body
LE: loop exit
PB: predicated region body
PF: predicated region fallthrough
CT: control target
= control target key end

     0   :  { %11 = vsyncpa [#allocation3], 0  ;;  %s646_s0 = inlined_call_operand.hbm [shape: f32[8,32], index: 0, kind: input, shape index: {}]   ;;  %s647_s1 = inlined_call_operand.hbm [shape: f32[8,16], index: 1, kind: input, shape index: {}]   ;;  %s648_s2 = inlined_call_operand.hbm [shape: f32[8,16], index: 2, kind: input, shape index: {}]   ;;  %s649_s3 = inlined_call_operand.hbm [shape: f32[32,64], index: 3, kind: input, shape index: {}]   ;;  %s650_s4 = inlined_call_operand.hbm [shape: f32[16,64], index: 4, kind: input, shape index: {}]   ;;  %s651_s5 = inlined_call_operand.vmem [shape: f32[1,64], index: 5, kind: input, shape index: {}]   ;;  %s652_s6 = inlined_call_operand.hbm [shape: f32[8,32], index: 6, kind: output, shape index: {}]  }
   0x1   :  { %12 = vsyncpa [#allocation6], 0 }
   0x2   :  { %13 = vsyncpa [#allocation9], 0 }
   0x3   :  { %14 = vsyncpa [#allocation4], 0  ;;  %s504_s21 = smov [#allocation5]   ;;  %s505_s23 = smov [#allocation8]  }
   0x4   :  { %s31_s22 = sshll.u32 %s504_s21, 4  ;;  %s50_s24 = sshll.u32 %s505_s23, 4  ;;  %s32_s22 = int_to_ptr.vmem [resolvable:$true] %s31_s22  ;;  %s554_s24 = int_to_ptr.vmem [resolvable:$true] %s50_s24 }
   0x5   :  { %s364_s27 = scalar_lea.hbm %s647_s1, 128 }
   0x6   :  { %p365_p0 = scmp.ne.s32.totalorder %s647_s1, %s364_s27  ;;  %p368_p1 = scmp.lt.u32.totalorder %s364_s27, %s647_s1 }
   0x8   :  { %p370_p2 = pnand %p368_p1, %p365_p0 }
   0xa   :  { %373 = shalt.err (!%p370_p2)
}
   0xb   :  { %s374_s8 = scalar_lea.vmem %s32_s22, 128  ;;  %p379_p4 = scmp.lt.s32.totalorder %s32_s22, %s32_s22 }
   0xc   :  { %p375_p3 = scmp.ne.s32.totalorder %s32_s22, %s374_s8  ;;  %p380_p5 = scmp.lt.s32.totalorder %s374_s8, %s374_s8 }
   0xe   :  { %p381_p6 = por %p380_p5, %p379_p4 }
  0x10   :  { %p382_p7 = pnand %p381_p6, %p375_p3 }
  0x12   :  { %385 = shalt.err (!%p382_p7)
}
  0x13   :  { %34 = dma.hbm_to_vmem [thread:$0]  %s647_s1, 128, %s32_s22, [#allocation6]  }
  0x14   :  { %s386_s13 = scalar_lea.hbm %s649_s3, 512 }
  0x15   :  { %p387_p8 = scmp.ne.s32.totalorder %s649_s3, %s386_s13  ;;  %p390_p9 = scmp.lt.u32.totalorder %s386_s13, %s649_s3 }
  0x17   :  { %p392_p10 = pnand %p390_p9, %p387_p8 }
  0x19   :  { %395 = shalt.err (!%p392_p10)
}
  0x1a   :  { %s396_s18 = scalar_lea.vmem %s554_s24, 512  ;;  %p401_p12 = scmp.lt.s32.totalorder %s554_s24, %s554_s24 }
  0x1b   :  { %p397_p11 = scmp.ne.s32.totalorder %s554_s24, %s396_s18  ;;  %p402_p13 = scmp.lt.s32.totalorder %s396_s18, %s396_s18 }
  0x1d   :  { %p403_p0 = por %p402_p13, %p401_p12 }
  0x1f   :  { %p404_p1 = pnand %p403_p0, %p397_p11 }
  0x21   :  { %407 = shalt.err (!%p404_p1)
}
  0x22   :  { %s506_s1 = smov 128   ;;  %s507_s19 = smov 8  }
  0x23   :  { %56 = dma.hbm_to_vmem [thread:$0]  %s649_s3, 512, %s554_s24, [#allocation9], %s506_s1, %s506_s1, %s507_s19  }
  0x24   :  { %s508_s22 = smov [#allocation2]   ;;  %s509_s25 = smov [#allocation7]  }
  0x25   :  { %s21_s23 = sshll.u32 %s508_s22, 4  ;;  %s41_s26 = sshll.u32 %s509_s25, 4  ;;  %s22_s23 = int_to_ptr.vmem [resolvable:$true] %s21_s23  ;;  %s42_s26 = int_to_ptr.vmem [resolvable:$true] %s41_s26 }
  0x26   :  { %s408_s29 = scalar_lea.hbm %s646_s0, 128 }
  0x27   :  { %p409_p2 = scmp.ne.s32.totalorder %s646_s0, %s408_s29  ;;  %p412_p3 = scmp.lt.u32.totalorder %s408_s29, %s646_s0 }
  0x29   :  { %p414_p4 = pnand %p412_p3, %p409_p2 }
  0x2b   :  { %417 = shalt.err (!%p414_p4)
}
  0x2c   :  { %s418_s3 = scalar_lea.vmem %s22_s23, 128  ;;  %p423_p6 = scmp.lt.s32.totalorder %s22_s23, %s22_s23 }
  0x2d   :  { %p419_p5 = scmp.ne.s32.totalorder %s22_s23, %s418_s3  ;;  %p424_p7 = scmp.lt.s32.totalorder %s418_s3, %s418_s3 }
  0x2f   :  { %p425_p8 = por %p424_p7, %p423_p6 }
  0x31   :  { %p426_p9 = pnand %p425_p8, %p419_p5 }
  0x33   :  { %429 = shalt.err (!%p426_p9)
}
  0x34   :  { %24 = dma.hbm_to_vmem [thread:$0]  %s646_s0, 128, %s22_s23, [#allocation3]  }
  0x35   :  { %s430_s13 = scalar_lea.hbm %s648_s2, 128 }
  0x36   :  { %p431_p10 = scmp.ne.s32.totalorder %s648_s2, %s430_s13  ;;  %p434_p11 = scmp.lt.u32.totalorder %s430_s13, %s648_s2 }
  0x38   :  { %p436_p12 = pnand %p434_p11, %p431_p10 }
  0x3a   :  { %439 = shalt.err (!%p436_p12)
}
  0x3b   :  { %s440_s18 = scalar_lea.vmem %s42_s26, 128  ;;  %p445_p0 = scmp.lt.s32.totalorder %s42_s26, %s42_s26 }
  0x3c   :  { %p441_p13 = scmp.ne.s32.totalorder %s42_s26, %s440_s18  ;;  %p446_p1 = scmp.lt.s32.totalorder %s440_s18, %s440_s18 }
  0x3e   :  { %p447_p2 = por %p446_p1, %p445_p0 }
  0x40   :  { %p448_p3 = pnand %p447_p2, %p441_p13 }
  0x42   :  { %451 = shalt.err (!%p448_p3)
}
  0x43   :  { %44 = dma.hbm_to_vmem [thread:$0]  %s648_s2, 128, %s42_s26, [#allocation6]  }
  0x44   :  { %s510_s21 = smov [#allocation10]   ;;  %s452_s27 = scalar_lea.hbm %s650_s4, 256 }
  0x45   :  { %s62_s22 = sshll.u32 %s510_s21, 4  ;;  %p453_p4 = scmp.ne.s32.totalorder %s650_s4, %s452_s27  ;;  %s63_s22 = int_to_ptr.vmem [resolvable:$true] %s62_s22 }
  0x46   :  { %p456_p5 = scmp.lt.u32.totalorder %s452_s27, %s650_s4 }
  0x48   :  { %p458_p6 = pnand %p456_p5, %p453_p4 }
  0x4a   :  { %461 = shalt.err (!%p458_p6)
}
  0x4b   :  { %s462_s8 = scalar_lea.vmem %s63_s22, 256  ;;  %p467_p8 = scmp.lt.s32.totalorder %s63_s22, %s63_s22 }
  0x4c   :  { %p463_p7 = scmp.ne.s32.totalorder %s63_s22, %s462_s8  ;;  %p468_p9 = scmp.lt.s32.totalorder %s462_s8, %s462_s8 }
  0x4e   :  { %p469_p10 = por %p468_p9, %p467_p8 }
  0x50   :  { %p470_p11 = pnand %p469_p10, %p463_p7 }
  0x52   :  { %473 = shalt.err (!%p470_p11)
}
  0x53   :  { %68 = dma.hbm_to_vmem [thread:$0]  %s650_s4, 256, %s63_s22, [#allocation9], %s506_s1, %s506_s1, %s507_s19  }
  0x54   :  { %496 = dma.done.wait [#allocation3], 128  }
  0x55   :  { %497 = vsyncadd [#allocation3], 4294967168 }
  0x56   :  { %498 = dma.done.wait [#allocation6], 256  }
  0x57   :  { %499 = vsyncadd [#allocation6], 4294967040 }
  0x58   :  { %500 = dma.done.wait [#allocation9], 768  }
  0x59   :  { %501 = vsyncadd [#allocation9], 4294966528  ;;  %v511_v0 = vmov 0.0|0.0   ;;  %vm512_vm0 = vmmov 0   ;;  %v513_v1 = vmov 0.0   ;;  %v88_v2 = vld [vmem:[#allocation8] sm:$0xff] }
  0x5a   :  { %335 = vmatprep.subr.bf16.mxu1 %v511_v0  ;;  %332 = vmatprep.subr.bf16.mxu0 %v511_v0  ;;  %v89_v3 = vld [vmem:[#allocation8 + $0x8] sm:$0xff]  ;;  %v93_v4 = vld [vmem:[#allocation10] sm:$0xff]  ;;  %v90_v7 = vld [vmem:[#allocation8 + $0x10] sm:$0xff]  ;;  %vm95_vm1 = vcmask 130048   ;;  %vm169_vm2 = vcmask 261120   ;;  %s514_s19 = smov 112  }
  0x5b   :  { %318 = vmatprep.mubr.msk.f32.mxu0 %vm512_vm0, %v513_v1  ;;  %329 = vmatprep.mubr.msk.f32.mxu1 %vm512_vm0, %v513_v1  ;;  %v336_v5 = vpack.c.bf16 %v89_v3, %v88_v2  ;;  %v94_v6 = vld [vmem:[#allocation10 + $0x8] sm:$0xff]  ;;  %v91_v8 = vld [vmem:[#allocation8 + $0x18] sm:$0xff]  ;;  %v92_v11 = vld [vmem:[#allocation5] sm:$0xff]  ;;  %s516_s9 = smov 48   ;;  %s517_s3 = smov 80  }
  0x5c   :  { %v333_v9 = vpack.c.bf16 %v94_v6, %v93_v4  ;;  %v339_v10 = vpack.c.bf16 %v91_v8, %v90_v7  ;;  %v87_v12 = vld [vmem:[#allocation2] sm:$0xff]  ;;  %v86_v27 = vld [vmem:[#allocation7] sm:$0xff]  ;;  %s518_s24 = smov [#allocation11]  }
  0x5d   :  { %337 = vmatpush3.bf16.msra.mxu1 %v336_v5  ;;  %v304_v16 = vld [vmem:[%s651_s5] ss:$0 sm:$0xff]  ;;  %s515_s5 = smov 16   ;;  %s291_s10 = sshll.u32 %s518_s24, 4  ;;  %s292_s10 = int_to_ptr.vmem [resolvable:$true] %s291_s10 }
  0x5e   :  { %334 = vmatpush3.bf16.msra.mxu0 %v333_v9  ;;  %338 = vmatprep.subr.bf16.mxu1 %v511_v0  ;;  %s474_s11 = scalar_lea.vmem %s292_s10, 128  ;;  %p479_p13 = scmp.lt.s32.totalorder %s292_s10, %s292_s10 }
  0x5f   :  { %p475_p12 = scmp.ne.s32.totalorder %s292_s10, %s474_s11  ;;  %p480_p0 = scmp.lt.s32.totalorder %s474_s11, %s474_s11 }
  0x61   :  { %340 = vmatpush3.bf16.msra.mxu1 %v339_v10  ;;  %319 = vmatmul.mubr.msk.f32.vlgmr.msra.gmra.mrb[0].mxu0 %vm95_vm1, %v92_v11  ;;  %p481_p1 = por %p480_p0, %p479_p13 }
  0x63   :  { %p482_p2 = pnand %p481_p1, %p475_p12 }
  0x64   :  { %330 = vmatmul.mubr.msk.f32.vlgmr.msra.gmra.mrb[0].mxu1 %vm169_vm2, %v87_v12 }
 0x134   :  { %v165_v13 = vpop.f32.mrb[0].mxu0 }
 0x135   :  { %v320_v14 = vpop.f32.mrb[1].mxu0 }
 0x137   :  { %v239_v15 = vpop.f32.mrb[0].mxu1 }
 0x138   :  { %v240_v17 = vadd.f32 %v239_v15, %v165_v13  ;;  %v331_v18 = vpop.f32.mrb[1].mxu1 }
 0x13a   :  { %v250_v19 = vadd.f32 %v304_v16, %v240_v17 }
 0x13c   :  { %356 = vtanh.f32 %v250_v19  ;;  %v305_v21 = vmul.f32 -1.442695, %v250_v19 }
 0x13e   :  { %358 = vpow2.f32 %v305_v21 }
 0x146   :  { %v357_v20 = vpop.eup %356 }
 0x147   :  { %260 = vrot.lane.b32.xlu0 %v357_v20, %s514_s19 }
 0x148   :  { %v359_v22 = vpop.eup %358 }
 0x149   :  { %v254_v23 = vadd.f32 1.0, %v359_v22 }
 0x14b   :  { %360 = vrcp.f32 %v254_v23 }
 0x155   :  { %v361_v24 = vpop.eup %360 }
 0x156   :  { %v258_v28 = vmul.f32 %v361_v24, %v86_v27 }
 0x1b9   :  { %v261_v25 = vpop.permute.xlu0 %260 }
 0x1ba   :  { %v263_v26 = vmul.f32 %v361_v24, %v261_v25 }
 0x1bc   :  { %265 = vrot.lane.b32.xlu0 %v263_v26, %s514_s19 }
 0x22e   :  { %v266_v29 = vpop.permute.xlu0 %265 }
 0x22f   :  { %v268_v30 = vadd.f32 %v266_v29, %v258_v28 }
 0x231   :  { %362 = vtanh.f32 %v268_v30  ;;  %280 = vrot.lane.b32.xlu0 %v268_v30, %s515_s5 }
 0x23b   :  { %v363_v31 = vpop.eup %362 }
 0x23c   :  { %271 = vrot.lane.b32.xlu1 %v363_v31, %s516_s9 }
 0x2a3   :  { %v281_v34 = vpop.permute.xlu0 %280 }
 0x2ae   :  { %v272_v32 = vpop.permute.xlu1 %271 }
 0x2af   :  { %v274_v33 = vmul.f32 %v361_v24, %v272_v32 }
 0x2b1   :  { %276 = vrot.lane.b32.xlu1 %v274_v33, %s517_s3 }
 0x323   :  { %v277_v35 = vpop.permute.xlu1 %276 }
 0x324   :  { %v283_v36 = vsel %vm95_vm1, %v277_v35, %v281_v34 }
 0x325   :  { %284 = vst.msk [vmem:[#allocation11] sm:$0xff] %vm169_vm2, %v283_v36 }
 0x326   :  { %485 = shalt.err (!%p482_p2)
}
 0x327   :  { %s486_s14 = scalar_lea.hbm %s652_s6, 128 }
 0x328   :  { %p487_p3 = scmp.ne.s32.totalorder %s652_s6, %s486_s14  ;;  %p490_p4 = scmp.lt.u32.totalorder %s486_s14, %s652_s6 }
 0x32a   :  { %p492_p5 = pnand %p490_p4, %p487_p3 }
 0x32c   :  { %495 = shalt.err (!%p492_p5)
}
 0x32d   :  { %294 = dma.vmem_to_hbm [thread:$0]  %s292_s10, 128, %s652_s6, [#allocation4]  }
 0x32e   :  { %502 = dma.done.wait [#allocation4], 128  }
 0x32f   :  { %503 = vsyncadd [#allocation4], 4294967168 }
 0x330   :  { %298 = vsyncpa [#allocation3], 1 }
 0x331   :  { %299 = vsyncpa [#allocation6], 1 }
 0x332   :  { %300 = vsyncpa [#allocation9], 1 }
 0x333   :  { %301 = vsyncpa [#allocation4], 1 }

</bundles_post_ra>
